<compile_context>
chip_gen: v7x
topology: tpu7x:2x2x1
jax: 0.10.0
libtpu: 0.0.40
codegen_flags: <defaults>
</compile_context>

<pallas_src>
import jax
import jax.numpy as jnp
from jax.experimental import pallas as pl
from jax.experimental.pallas import tpu as pltpu


_BLK_B = 8  # batch rows per grid step = one full sublane tile of the f32 output


def _gather_add_kernel(vid_ref, lid_ref,      # SMEM scalar prefetch: (B_pad,) int32 each
                       vtab_ref, ltab_ref,    # VMEM-resident folded tables: (Vpad, D), (Lpad, D) f32
                       o_ref):                # VMEM out block: (_BLK_B, D)
    blk = o_ref.shape[0]                      # static
    base = pl.program_id(0) * blk
    # Unrolled in-kernel gather: one (1, D) dynamic row load per batch row, then a
    # single vadd and one full-tile (8, 256) unmasked store.
    vrows = [vtab_ref[pl.ds(vid_ref[base + r], 1), :] for r in range(blk)]
    lrows = [ltab_ref[pl.ds(lid_ref[base + r], 1), :] for r in range(blk)]
    v = jnp.concatenate(vrows, axis=0)        # (blk, D)
    l = jnp.concatenate(lrows, axis=0)        # (blk, D)
    o_ref[...] = (v + l).astype(o_ref.dtype)


def _pad_rows_to8(t):
    pad = (-t.shape[0]) % 8
    return jnp.pad(t, ((0, pad), (0, 0))) if pad else t


def prepare_params(params):
    """One-time (init) prep: fold the projection Linear into the embedding tables."""
    vtab = params["voice_embeddings"].astype(jnp.float32)      # (num_voices, D)
    ltab = params["language_embeddings"].astype(jnp.float32)   # (num_langs, D//4)
    w = params["proj_w"].astype(jnp.float32)                   # (D, D + D//4) torch layout (out, in)
    bias = params["proj_b"].astype(jnp.float32)                # (D,)
    d = vtab.shape[1]

    w_t = w.T                                                  # (D + D//4, D)
    wv_t = w_t[:d, :]                                          # (D, D)
    wl_t = w_t[d:, :]                                          # (D//4, D)

    packed_v = vtab @ wv_t                                     # (num_voices, D)
    packed_l = ltab @ wl_t + bias[None, :]                     # (num_langs, D), bias folded in

    out = dict(params)
    # Keep tables 2-D (no (rows,1,D) sublane padding); pad row count to a multiple of 8.
    out["packed_voice_table"] = _pad_rows_to8(packed_v)
    out["packed_lang_table"] = _pad_rows_to8(packed_l)
    return out


def voice_packet_embedding(voice_id, params, language_id=None, *, min_pallas_batch=32):
    """JAX/Pallas equivalent of VoicePacketEmbedding.forward."""
    vtab = params["voice_embeddings"]
    num_voices, voice_dim = vtab.shape
    num_langs = params["language_embeddings"].shape[0]

    scalar_in = (jnp.ndim(voice_id) == 0) and (
        language_id is None or jnp.ndim(language_id) == 0)

    vid = jnp.atleast_1d(jnp.asarray(voice_id, jnp.int32))

    if language_id is None:
        # Pure embedding lookup (no projection in this branch).
        out = jnp.take(vtab, jnp.clip(vid, 0, num_voices - 1), axis=0)
        return out[0] if scalar_in else out

    if "packed_voice_table" not in params:
        raise ValueError(
            "params must be pre-folded with prepare_params(); folding inside the "
            "forward would silently re-run the fold on every call under jit.")

    packed_v = params["packed_voice_table"]   # (Vpad, D) f32, rows padded to multiple of 8
    packed_l = params["packed_lang_table"]    # (Lpad, D) f32, bias folded in

    lid = jnp.atleast_1d(jnp.asarray(language_id, jnp.int32))

    # Symmetric length-1 broadcast (fixes the previous vid/lid asymmetry).
    b = max(vid.shape[0], lid.shape[0])
    if vid.shape[0] != b:
        vid = jnp.broadcast_to(vid, (b,))
    if lid.shape[0] != b:
        lid = jnp.broadcast_to(lid, (b,))

    # Clamp: in-kernel dynamic row loads have no runtime bounds check.
    vid = jnp.clip(vid, 0, num_voices - 1)
    lid = jnp.clip(lid, 0, num_langs - 1)

    d = voice_dim

    # Small-batch bypass: a few-KiB gather+add is cheaper as fused XLA than a
    # Pallas custom-call dispatch + pipeline prologue.
    if b < min_pallas_batch:
        out = jnp.take(packed_v, vid, axis=0) + jnp.take(packed_l, lid, axis=0)
        return out[0] if scalar_in else out

    blk_b = _BLK_B
    b_pad = ((b + blk_b - 1) // blk_b) * blk_b
    if b_pad != b:
        vid_p = jnp.zeros((b_pad,), jnp.int32).at[:b].set(vid)
        lid_p = jnp.zeros((b_pad,), jnp.int32).at[:b].set(lid)
    else:
        vid_p, lid_p = vid, lid

    grid_spec = pltpu.PrefetchScalarGridSpec(
        num_scalar_prefetch=2,
        grid=(b_pad // blk_b,),
        in_specs=[
            # Whole (tiny) folded tables resident in VMEM: full-array blocks with a
            # constant index_map, so they are DMA'd once and reused every grid step.
            pl.BlockSpec(packed_v.shape, lambda i, vid_r, lid_r: (0, 0)),
            pl.BlockSpec(packed_l.shape, lambda i, vid_r, lid_r: (0, 0)),
        ],
        # Lane/sublane-dense 2-D output block -> unmasked full-vreg stores.
        out_specs=pl.BlockSpec((blk_b, d), lambda i, vid_r, lid_r: (i, 0)),
    )

    out_pad = pl.pallas_call(
        _gather_add_kernel,
        out_shape=jax.ShapeDtypeStruct((b_pad, d), jnp.float32),
        grid_spec=grid_spec,
        compiler_params=pltpu.CompilerParams(dimension_semantics=("parallel",)),
    )(vid_p, lid_p, packed_v, packed_l)

    out = out_pad[:b]
    return out[0] if scalar_in else out


def init_params(key, num_voices=54, voice_dim=256):
    """Deterministic synthetic parameters matching the PyTorch module's shapes."""
    k1, k2, k3, k4 = jax.random.split(key, 4)
    in_dim = voice_dim + voice_dim // 4
    bound = 1.0 / jnp.sqrt(in_dim)
    return {
        "voice_embeddings": jax.random.normal(k1, (num_voices, voice_dim), jnp.float32),
        "language_embeddings": jax.random.normal(k2, (8, voice_dim // 4), jnp.float32),
        "proj_w": jax.random.uniform(k3, (voice_dim, in_dim), jnp.float32, -bound, bound),
        "proj_b": jax.random.uniform(k4, (voice_dim,), jnp.float32, -bound, bound),
    }


def _reference(params, vid, lid):
    v = jnp.take(params["voice_embeddings"], vid, axis=0)
    l = jnp.take(params["language_embeddings"], lid, axis=0)
    return jnp.concatenate([v, l], axis=-1) @ params["proj_w"].T + params["proj_b"]


if __name__ == "__main__":
    key = jax.random.PRNGKey(0)
    num_voices, voice_dim = 54, 256
    params = prepare_params(init_params(key, num_voices, voice_dim))

    # --- default path (small-batch XLA bypass), B = 2 ---
    voice_id = jnp.array([3, 17], dtype=jnp.int32)
    language_id = jnp.array([1, 5], dtype=jnp.int32)
    out = jax.block_until_ready(voice_packet_embedding(voice_id, params, language_id))
    assert out.shape == (2, voice_dim), out.shape
    ref = _reference(params, voice_id, language_id)
    assert jnp.allclose(out, ref, atol=1e-4, rtol=1e-4), float(jnp.max(jnp.abs(out - ref)))

    # --- forced Pallas path, B = 2 (padded to one 8-row block) ---
    out_p = jax.block_until_ready(
        voice_packet_embedding(voice_id, params, language_id, min_pallas_batch=1))
    assert out_p.shape == (2, voice_dim), out_p.shape
    assert jnp.allclose(out_p, ref, atol=1e-4, rtol=1e-4), float(jnp.max(jnp.abs(out_p - ref)))

    # --- forced Pallas path, B = 11 (padding + 2 grid steps) ---
    vid_b = jnp.arange(11, dtype=jnp.int32) * 4 % num_voices
    lid_b = jnp.arange(11, dtype=jnp.int32) % 8
    out_b = jax.block_until_ready(
        voice_packet_embedding(vid_b, params, lid_b, min_pallas_batch=1))
    assert out_b.shape == (11, voice_dim), out_b.shape
    ref_b = _reference(params, vid_b, lid_b)
    assert jnp.allclose(out_b, ref_b, atol=1e-4, rtol=1e-4), float(jnp.max(jnp.abs(out_b - ref_b)))

    # --- scalar-input path ---
    out_s = jax.block_until_ready(voice_packet_embedding(jnp.int32(5), params, jnp.int32(2)))
    assert out_s.shape == (voice_dim,), out_s.shape
    ref_s = _reference(params, jnp.array([5], jnp.int32), jnp.array([2], jnp.int32))[0]
    assert jnp.allclose(out_s, ref_s, atol=1e-4, rtol=1e-4)

    # --- language_id=None branch (embedding lookup only) ---
    out_v = jax.block_until_ready(voice_packet_embedding(voice_id, params, None))
    assert jnp.allclose(out_v, jnp.take(params["voice_embeddings"], voice_id, axis=0))

    print("KERNEL_OK")
</pallas_src>

<mosaic_0001>
module attributes {stable_mosaic.version = 11 : i64} {
  func.func @_gather_add_kernel(%arg0: i32, %arg1: memref<8xi32, #tpu.memory_space<smem>>, %arg2: memref<8xi32, #tpu.memory_space<smem>>, %arg3: memref<56x256xf32, #tpu.memory_space<vmem>>, %arg4: memref<8x256xf32, #tpu.memory_space<vmem>>, %arg5: memref<8x256xf32, #tpu.memory_space<vmem>>) attributes {dimension_semantics = [#tpu.dimension_semantics<parallel>], iteration_bounds = array<i64: 1>, scalar_prefetch = 2 : i64, scratch_operands = 0 : i64, tpu.core_type = #tpu.core_type<tc>, window_params = [{pipeline_mode = #tpu.pipeline_mode<synchronous>, transform_indices = @transform_0, window_bounds = array<i64: 56, 256>}, {pipeline_mode = #tpu.pipeline_mode<synchronous>, transform_indices = @transform_1, window_bounds = array<i64: 8, 256>}, {transform_indices = @transform_2, window_bounds = array<i64: 8, 256>}]} {
    %c8_i32 = arith.constant 8 : i32
    %0 = arith.muli %arg0, %c8_i32 : i32
    %c0_i32 = arith.constant 0 : i32
    %1 = arith.addi %0, %c0_i32 : i32
    %2 = arith.index_cast %1 : i32 to index
    %3 = memref.load %arg1[%2] : memref<8xi32, #tpu.memory_space<smem>>
    %4 = arith.index_cast %3 : i32 to index
    %c0 = arith.constant 0 : index
    %5 = vector.load %arg3[%4, %c0] : memref<56x256xf32, #tpu.memory_space<vmem>>, vector<1x256xf32>
    %c1_i32 = arith.constant 1 : i32
    %6 = arith.addi %0, %c1_i32 : i32
    %7 = arith.index_cast %6 : i32 to index
    %8 = memref.load %arg1[%7] : memref<8xi32, #tpu.memory_space<smem>>
    %9 = arith.index_cast %8 : i32 to index
    %c0_0 = arith.constant 0 : index
    %10 = vector.load %arg3[%9, %c0_0] : memref<56x256xf32, #tpu.memory_space<vmem>>, vector<1x256xf32>
    %c2_i32 = arith.constant 2 : i32
    %11 = arith.addi %0, %c2_i32 : i32
    %12 = arith.index_cast %11 : i32 to index
    %13 = memref.load %arg1[%12] : memref<8xi32, #tpu.memory_space<smem>>
    %14 = arith.index_cast %13 : i32 to index
    %c0_1 = arith.constant 0 : index
    %15 = vector.load %arg3[%14, %c0_1] : memref<56x256xf32, #tpu.memory_space<vmem>>, vector<1x256xf32>
    %c3_i32 = arith.constant 3 : i32
    %16 = arith.addi %0, %c3_i32 : i32
    %17 = arith.index_cast %16 : i32 to index
    %18 = memref.load %arg1[%17] : memref<8xi32, #tpu.memory_space<smem>>
    %19 = arith.index_cast %18 : i32 to index
    %c0_2 = arith.constant 0 : index
    %20 = vector.load %arg3[%19, %c0_2] : memref<56x256xf32, #tpu.memory_space<vmem>>, vector<1x256xf32>
    %c4_i32 = arith.constant 4 : i32
    %21 = arith.addi %0, %c4_i32 : i32
    %22 = arith.index_cast %21 : i32 to index
    %23 = memref.load %arg1[%22] : memref<8xi32, #tpu.memory_space<smem>>
    %24 = arith.index_cast %23 : i32 to index
    %c0_3 = arith.constant 0 : index
    %25 = vector.load %arg3[%24, %c0_3] : memref<56x256xf32, #tpu.memory_space<vmem>>, vector<1x256xf32>
    %c5_i32 = arith.constant 5 : i32
    %26 = arith.addi %0, %c5_i32 : i32
    %27 = arith.index_cast %26 : i32 to index
    %28 = memref.load %arg1[%27] : memref<8xi32, #tpu.memory_space<smem>>
    %29 = arith.index_cast %28 : i32 to index
    %c0_4 = arith.constant 0 : index
    %30 = vector.load %arg3[%29, %c0_4] : memref<56x256xf32, #tpu.memory_space<vmem>>, vector<1x256xf32>
    %c6_i32 = arith.constant 6 : i32
    %31 = arith.addi %0, %c6_i32 : i32
    %32 = arith.index_cast %31 : i32 to index
    %33 = memref.load %arg1[%32] : memref<8xi32, #tpu.memory_space<smem>>
    %34 = arith.index_cast %33 : i32 to index
    %c0_5 = arith.constant 0 : index
    %35 = vector.load %arg3[%34, %c0_5] : memref<56x256xf32, #tpu.memory_space<vmem>>, vector<1x256xf32>
    %c7_i32 = arith.constant 7 : i32
    %36 = arith.addi %0, %c7_i32 : i32
    %37 = arith.index_cast %36 : i32 to index
    %38 = memref.load %arg1[%37] : memref<8xi32, #tpu.memory_space<smem>>
    %39 = arith.index_cast %38 : i32 to index
    %c0_6 = arith.constant 0 : index
    %40 = vector.load %arg3[%39, %c0_6] : memref<56x256xf32, #tpu.memory_space<vmem>>, vector<1x256xf32>
    %c0_i32_7 = arith.constant 0 : i32
    %41 = arith.addi %0, %c0_i32_7 : i32
    %42 = arith.index_cast %41 : i32 to index
    %43 = memref.load %arg2[%42] : memref<8xi32, #tpu.memory_space<smem>>
    %44 = arith.index_cast %43 : i32 to index
    %c0_8 = arith.constant 0 : index
    %45 = vector.load %arg4[%44, %c0_8] : memref<8x256xf32, #tpu.memory_space<vmem>>, vector<1x256xf32>
    %c1_i32_9 = arith.constant 1 : i32
    %46 = arith.addi %0, %c1_i32_9 : i32
    %47 = arith.index_cast %46 : i32 to index
    %48 = memref.load %arg2[%47] : memref<8xi32, #tpu.memory_space<smem>>
    %49 = arith.index_cast %48 : i32 to index
    %c0_10 = arith.constant 0 : index
    %50 = vector.load %arg4[%49, %c0_10] : memref<8x256xf32, #tpu.memory_space<vmem>>, vector<1x256xf32>
    %c2_i32_11 = arith.constant 2 : i32
    %51 = arith.addi %0, %c2_i32_11 : i32
    %52 = arith.index_cast %51 : i32 to index
    %53 = memref.load %arg2[%52] : memref<8xi32, #tpu.memory_space<smem>>
    %54 = arith.index_cast %53 : i32 to index
    %c0_12 = arith.constant 0 : index
    %55 = vector.load %arg4[%54, %c0_12] : memref<8x256xf32, #tpu.memory_space<vmem>>, vector<1x256xf32>
    %c3_i32_13 = arith.constant 3 : i32
    %56 = arith.addi %0, %c3_i32_13 : i32
    %57 = arith.index_cast %56 : i32 to index
    %58 = memref.load %arg2[%57] : memref<8xi32, #tpu.memory_space<smem>>
    %59 = arith.index_cast %58 : i32 to index
    %c0_14 = arith.constant 0 : index
    %60 = vector.load %arg4[%59, %c0_14] : memref<8x256xf32, #tpu.memory_space<vmem>>, vector<1x256xf32>
    %c4_i32_15 = arith.constant 4 : i32
    %61 = arith.addi %0, %c4_i32_15 : i32
    %62 = arith.index_cast %61 : i32 to index
    %63 = memref.load %arg2[%62] : memref<8xi32, #tpu.memory_space<smem>>
    %64 = arith.index_cast %63 : i32 to index
    %c0_16 = arith.constant 0 : index
    %65 = vector.load %arg4[%64, %c0_16] : memref<8x256xf32, #tpu.memory_space<vmem>>, vector<1x256xf32>
    %c5_i32_17 = arith.constant 5 : i32
    %66 = arith.addi %0, %c5_i32_17 : i32
    %67 = arith.index_cast %66 : i32 to index
    %68 = memref.load %arg2[%67] : memref<8xi32, #tpu.memory_space<smem>>
    %69 = arith.index_cast %68 : i32 to index
    %c0_18 = arith.constant 0 : index
    %70 = vector.load %arg4[%69, %c0_18] : memref<8x256xf32, #tpu.memory_space<vmem>>, vector<1x256xf32>
    %c6_i32_19 = arith.constant 6 : i32
    %71 = arith.addi %0, %c6_i32_19 : i32
    %72 = arith.index_cast %71 : i32 to index
    %73 = memref.load %arg2[%72] : memref<8xi32, #tpu.memory_space<smem>>
    %74 = arith.index_cast %73 : i32 to index
    %c0_20 = arith.constant 0 : index
    %75 = vector.load %arg4[%74, %c0_20] : memref<8x256xf32, #tpu.memory_space<vmem>>, vector<1x256xf32>
    %c7_i32_21 = arith.constant 7 : i32
    %76 = arith.addi %0, %c7_i32_21 : i32
    %77 = arith.index_cast %76 : i32 to index
    %78 = memref.load %arg2[%77] : memref<8xi32, #tpu.memory_space<smem>>
    %79 = arith.index_cast %78 : i32 to index
    %c0_22 = arith.constant 0 : index
    %80 = vector.load %arg4[%79, %c0_22] : memref<8x256xf32, #tpu.memory_space<vmem>>, vector<1x256xf32>
    %81 = tpu.concatenate %5, %10, %15, %20, %25, %30, %35, %40 in 0 : vector<1x256xf32>, vector<1x256xf32>, vector<1x256xf32>, vector<1x256xf32>, vector<1x256xf32>, vector<1x256xf32>, vector<1x256xf32>, vector<1x256xf32> -> vector<8x256xf32>
    %82 = tpu.concatenate %45, %50, %55, %60, %65, %70, %75, %80 in 0 : vector<1x256xf32>, vector<1x256xf32>, vector<1x256xf32>, vector<1x256xf32>, vector<1x256xf32>, vector<1x256xf32>, vector<1x256xf32>, vector<1x256xf32> -> vector<8x256xf32>
    %83 = arith.addf %81, %82 : vector<8x256xf32>
    %c0_23 = arith.constant 0 : index
    %c0_24 = arith.constant 0 : index
    %84 = vector.load %arg5[%c0_23, %c0_24] : memref<8x256xf32, #tpu.memory_space<vmem>>, vector<8x256xf32>
    tpu.vector_store %arg5[%c0_23, %c0_24], %83 {strides = array<i32>} : memref<8x256xf32, #tpu.memory_space<vmem>>, vector<8x256xf32>,
    return
  }
  func.func @transform_0(%arg0: i32, %arg1: memref<8xi32, #tpu.memory_space<smem>>, %arg2: memref<8xi32, #tpu.memory_space<smem>>) -> (i32, i32) {
    %c0_i32 = arith.constant 0 : i32
    %c0_i32_0 = arith.constant 0 : i32
    %c0_i32_1 = arith.constant 0 : i32
    return %c0_i32, %c0_i32_0 : i32, i32
  }
  func.func @transform_1(%arg0: i32, %arg1: memref<8xi32, #tpu.memory_space<smem>>, %arg2: memref<8xi32, #tpu.memory_space<smem>>) -> (i32, i32) {
    %c0_i32 = arith.constant 0 : i32
    %c0_i32_0 = arith.constant 0 : i32
    %c0_i32_1 = arith.constant 0 : i32
    return %c0_i32, %c0_i32_0 : i32, i32
  }
  func.func @transform_2(%arg0: i32, %arg1: memref<8xi32, #tpu.memory_space<smem>>, %arg2: memref<8xi32, #tpu.memory_space<smem>>) -> (i32, i32) {
    %c0_i32 = arith.constant 0 : i32
    %c0_i32_0 = arith.constant 0 : i32
    return %arg0, %c0_i32 : i32, i32
  }
}

</mosaic_0001>

<bundles_post_ra>
// kernel: tpu_custom_call.1
= control target key start
LH: loop header
LB: loop body
LE: loop exit
PB: predicated region body
PF: predicated region fallthrough
CT: control target
= control target key end

     0   :  { %s888_s0 = inlined_call_operand.hbm [shape: s32[8], index: 0, kind: input, shape index: {}]   ;;  %s889_s2 = inlined_call_operand.hbm [shape: f32[56,256], index: 2, kind: input, shape index: {}]   ;;  %s890_s3 = inlined_call_operand.hbm [shape: f32[8,256], index: 3, kind: input, shape index: {}]   ;;  %s891_s4 = inlined_call_operand.hbm [shape: f32[8,256], index: 4, kind: output, shape index: {}]   ;;  %s892_s1 = inlined_call_operand.vmem [shape: s32[8], index: 1, kind: input, shape index: {}]  }
   0x1   :  { %s564_s17 = scalar_lea.hbm %s888_s0, 16 }
   0x2   :  { %p565_p0 = scmp.ne.s32.totalorder %s888_s0, %s564_s17  ;;  %p568_p1 = scmp.lt.u32.totalorder %s564_s17, %s888_s0 }
   0x4   :  { %p570_p2 = pnand %p568_p1, %p565_p0 }
   0x6   :  { %573 = shalt.err (!%p570_p2)  }
   0x7   :  { %s660_s22 = smov [#allocation3]   ;;  %s11_s27 = sshll.u32 %s892_s1, 4  ;;  %s12_s27 = int_to_ptr.vmem [resolvable:$true] %s11_s27 }
   0x8   :  { %10 = dma.hbm_to_smem %s888_s0, 16, %s660_s22, [#allocation2] }
   0x9   :  { %s574_s28 = scalar_lea.vmem %s12_s27, 16  ;;  %p579_p4 = scmp.lt.s32.totalorder %s12_s27, %s12_s27 }
   0xa   :  { %p575_p3 = scmp.ne.s32.totalorder %s12_s27, %s574_s28  ;;  %p580_p5 = scmp.lt.s32.totalorder %s574_s28, %s574_s28 }
   0xc   :  { %p581_p6 = por %p580_p5, %p579_p4 }
   0xe   :  { %p582_p7 = pnand %p581_p6, %p575_p3 }
  0x10   :  { %585 = shalt.err (!%p582_p7)  }
  0x11   :  { %s661_s29 = smov [#allocation4]  }
  0x12   :  { %14 = dma.vmem_to_smem %s12_s27, 16, %s661_s29, [#allocation2] }
  0x13   :  { %652 = dma.done.wait [#allocation2], 32 }
  0x14   :  { %653 = vsyncadd [#allocation2], 4294967264 }
  0x15   :  { %16 = sfence }
  0x16   :  { %17 = vsyncpa [#allocation6], 0 }
  0x17   :  { %18 = vsyncpa [#allocation9], 0 }
  0x18   :  { %19 = vsyncpa [#allocation7], 0  ;;  %s662_s0 = smov [#allocation5]   ;;  %s586_s6 = scalar_lea.hbm %s889_s2, 1792 }
  0x19   :  { %s25_s30 = sshll.u32 %s662_s0, 4  ;;  %p587_p8 = scmp.ne.s32.totalorder %s889_s2, %s586_s6  ;;  %s26_s30 = int_to_ptr.vmem [resolvable:$true] %s25_s30 }
  0x1a   :  { %p590_p9 = scmp.lt.u32.totalorder %s586_s6, %s889_s2 }
  0x1c   :  { %p592_p10 = pnand %p590_p9, %p587_p8 }
  0x1e   :  { %595 = shalt.err (!%p592_p10)
}
  0x1f   :  { %s596_s11 = scalar_lea.vmem %s26_s30, 1792  ;;  %p601_p12 = scmp.lt.s32.totalorder %s26_s30, %s26_s30 }
  0x20   :  { %p597_p11 = scmp.ne.s32.totalorder %s26_s30, %s596_s11  ;;  %p602_p13 = scmp.lt.s32.totalorder %s596_s11, %s596_s11 }
  0x22   :  { %p603_p0 = por %p602_p13, %p601_p12 }
  0x24   :  { %p604_p1 = pnand %p603_p0, %p597_p11 }
  0x26   :  { %607 = shalt.err (!%p604_p1)
}
  0x27   :  { %s663_s12 = smov 256   ;;  %s664_s13 = smov 16  }
  0x28   :  { %31 = dma.hbm_to_vmem [thread:$0]  %s889_s2, 1792, %s26_s30, [#allocation6], %s663_s12, %s663_s12, %s664_s13  }
  0x29   :  { %s665_s16 = smov [#allocation8]   ;;  %s608_s20 = scalar_lea.hbm %s890_s3, 256 }
  0x2a   :  { %s38_s17 = sshll.u32 %s665_s16, 4  ;;  %p609_p2 = scmp.ne.s32.totalorder %s890_s3, %s608_s20  ;;  %s39_s17 = int_to_ptr.vmem [resolvable:$true] %s38_s17 }
  0x2b   :  { %p612_p3 = scmp.lt.u32.totalorder %s608_s20, %s890_s3 }
  0x2d   :  { %p614_p4 = pnand %p612_p3, %p609_p2 }
  0x2f   :  { %617 = shalt.err (!%p614_p4)
}
  0x30   :  { %s618_s25 = scalar_lea.vmem %s39_s17, 256  ;;  %p623_p6 = scmp.lt.s32.totalorder %s39_s17, %s39_s17 }
  0x31   :  { %p619_p5 = scmp.ne.s32.totalorder %s39_s17, %s618_s25  ;;  %p624_p7 = scmp.lt.s32.totalorder %s618_s25, %s618_s25 }
  0x33   :  { %p625_p8 = por %p624_p7, %p623_p6 }
  0x35   :  { %p626_p9 = pnand %p625_p8, %p619_p5 }
  0x37   :  { %629 = shalt.err (!%p626_p9)
}
  0x38   :  { %41 = dma.hbm_to_vmem [thread:$0]  %s890_s3, 256, %s39_s17, [#allocation9]  }
  0x39   :  { %654 = dma.done.wait [#allocation6], 1792  }
  0x3a   :  { %655 = vsyncadd [#allocation6], 4294965504 }
  0x3b   :  { %656 = dma.done.wait [#allocation9], 256  }
  0x3c   :  { %657 = vsyncadd [#allocation9], 4294967040  ;;  %s49_s27 = sld [smem:[#allocation3]]  ;;  %s497_s28 = sld [smem:[#allocation3 + $0x1]]  ;;  %v217_v0 = vlaneseq  ;;  %vm304_vm0 = vcmask 1040384   ;;  %vm307_vm1 = vcmask 1041408  }
  0x3d   :  { %s500_s29 = sld [smem:[#allocation3 + $0x2]]  ;;  %s731_s0 = sld [smem:[#allocation3 + $0x3]]  ;;  %vm310_vm2 = vcmask 1042432   ;;  %vm313_vm3 = vcmask 1043456   ;;  %vm316_vm4 = vcmask 1044480   ;;  %vm319_vm5 = vcmask 1045504  }
  0x3e   :  { %s733_s30 = sld [smem:[#allocation3 + $0x4]]  ;;  %s735_s1 = sld [smem:[#allocation3 + $0x5]]  ;;  %v218_v1 = vshrl.u32 %v217_v0, 7  ;;  %vm322_vm6 = vcmask 1046528  }
  0x3f   :  { %s737_s5 = sld [smem:[#allocation3 + $0x6]]  ;;  %s739_s6 = sld [smem:[#allocation3 + $0x7]] }
  0x40   :  { %s741_s7 = sld [smem:[#allocation4]]  ;;  %s743_s12 = sld [smem:[#allocation4 + $0x1]]  ;;  %v774_v2 = vsub.s32 0, %v218_v1  ;;  %v780_v4 = vsub.s32 1, %v218_v1 }
  0x41   :  { %s745_s14 = sld [smem:[#allocation4 + $0x2]]  ;;  %s751_s20 = sld [smem:[#allocation4 + $0x3]] }
  0x42   :  { %s50_s3 = sshra.s32 %s49_s27, 3  ;;  %s53_s8 = sand.u32 7, %s49_s27 }
  0x43   :  { %s541_s9 = sshll.u32 %s50_s3, 4  ;;  %s61_s10 = sshra.s32 %s497_s28, 3 }
  0x44   :  { %s64_s11 = sand.u32 7, %s497_s28  ;;  %s542_s13 = sshll.u32 %s61_s10, 4 }
  0x45   :  { %s747_s15 = sadd.s32 %s541_s9, %s53_s8  ;;  %s72_s16 = sshra.s32 %s500_s29, 3 }
  0x46   :  { %s749_s17 = sadd.s32 %s542_s13, %s64_s11  ;;  %s75_s18 = sand.u32 7, %s500_s29 }
  0x47   :  { %s543_s19 = sshll.u32 %s72_s16, 4  ;;  %s83_s21 = sshra.s32 %s731_s0, 3 }
  0x48   :  { %s754_s22 = sadd.s32 %s543_s19, %s75_s18  ;;  %s86_s23 = sand.u32 7, %s731_s0 }
  0x49   :  { %s94_s24 = sshra.s32 %s733_s30, 3  ;;  %s544_s25 = sshll.u32 %s83_s21, 4 }
  0x4a   :  { %s97_s2 = sand.u32 7, %s733_s30  ;;  %s545_s26 = sshll.u32 %s94_s24, 4 }
  0x4b   :  { %s105_s27 = sshra.s32 %s735_s1, 3  ;;  %s108_s28 = sand.u32 7, %s735_s1 }
  0x4c   :  { %s761_s29 = sadd.s32 %s544_s25, %s86_s23  ;;  %s546_s3 = sshll.u32 %s105_s27, 4 }
  0x4d   :  { %s763_s8 = sadd.s32 %s545_s26, %s97_s2  ;;  %s116_s9 = sshra.s32 %s737_s5, 3 }
  0x4e   :  { %s766_s0 = sadd.s32 %s546_s3, %s108_s28  ;;  %s119_s10 = sand.u32 7, %s737_s5 }
  0x4f   :  { %s547_s30 = sshll.u32 %s116_s9, 4  ;;  %s127_s11 = sshra.s32 %s739_s6, 3 }
  0x50   :  { %s770_s13 = sadd.s32 %s547_s30, %s119_s10  ;;  %s130_s1 = sand.u32 7, %s739_s6 }
  0x51   :  { %s137_s16 = sshra.s32 %s741_s7, 3  ;;  %s57_s18 = scalar_lea.vmem [#allocation5], %s747_s15 }
  0x52   :  { %v58_v3 = vld [vmem:[%s57_s18] ss:$8 sm:$0x3]  ;;  %s777_s19 = sshll.u32 %s127_s11, 4  ;;  %s140_s21 = sand.u32 7, %s741_s7 }
  0x53   :  { %s68_s5 = scalar_lea.vmem [#allocation5], %s749_s17  ;;  %s549_s23 = sshll.u32 %s137_s16, 4  ;;  %v220_v7 = vrot.slane %v58_v3, %v774_v2  ;;  %v224_v9 = vrot.slane %v58_v3, %v780_v4 }
  0x54   :  { %v69_v5 = vld [vmem:[%s68_s5] ss:$8 sm:$0x3]  ;;  %s147_s24 = sshra.s32 %s743_s12, 3  ;;  %s143_s25 = sadd.s32 %s549_s23, %s140_s21 }
  0x55   :  { %s150_s2 = sand.u32 7, %s743_s12  ;;  %s550_s26 = sshll.u32 %s147_s24, 4  ;;  %v231_v8 = vrot.slane %v69_v5, %v774_v2  ;;  %v235_v10 = vrot.slane %v69_v5, %v780_v4 }
  0x56   :  { %s79_s27 = scalar_lea.vmem [#allocation5], %s754_s22  ;;  %s153_s28 = sadd.s32 %s550_s26, %s150_s2 }
  0x57   :  { %v80_v6 = vld [vmem:[%s79_s27] ss:$8 sm:$0x3]  ;;  %s157_s15 = sshra.s32 %s745_s14, 3  ;;  %s144_s7 = scalar_lea.vmem [#allocation8], %s143_s25  ;;  %v305_v16 = vsel %vm304_vm0, %v220_v7, %v231_v8  ;;  %v306_v17 = vsel %vm304_vm0, %v224_v9, %v235_v10 }
  0x58   :  { %v145_v11 = vld [vmem:[%s144_s7] ss:$8 sm:$0x3]  ;;  %s160_s17 = sand.u32 7, %s745_s14  ;;  %s154_s12 = scalar_lea.vmem [#allocation8], %s153_s28  ;;  %v242_v14 = vrot.slane %v80_v6, %v774_v2  ;;  %v246_v15 = vrot.slane %v80_v6, %v780_v4 }
  0x59   :  { %v155_v12 = vld [vmem:[%s154_s12] ss:$8 sm:$0x3]  ;;  %s551_s22 = sshll.u32 %s157_s15, 4  ;;  %s167_s3 = sshra.s32 %s751_s20, 3  ;;  %v329_v19 = vrot.slane %v145_v11, %v774_v2  ;;  %v333_v21 = vrot.slane %v145_v11, %v780_v4 }
  0x5a   :  { %s90_s9 = scalar_lea.vmem [#allocation5], %s761_s29  ;;  %s163_s10 = sadd.s32 %s551_s22, %s160_s17  ;;  %v340_v20 = vrot.slane %v155_v12, %v774_v2  ;;  %v344_v22 = vrot.slane %v155_v12, %v780_v4  ;;  %v308_v26 = vsel %vm307_vm1, %v305_v16, %v242_v14  ;;  %v309_v27 = vsel %vm307_vm1, %v306_v17, %v246_v15 }
  0x5b   :  { %v91_v13 = vld [vmem:[%s90_s9] ss:$8 sm:$0x3]  ;;  %s170_s30 = sand.u32 7, %s751_s20  ;;  %s552_s11 = sshll.u32 %s167_s3, 4 }
  0x5c   :  { %s164_s14 = scalar_lea.vmem [#allocation8], %s163_s10  ;;  %s173_s16 = sadd.s32 %s552_s11, %s170_s30  ;;  %v253_v24 = vrot.slane %v91_v13, %v774_v2  ;;  %v257_v25 = vrot.slane %v91_v13, %v780_v4  ;;  %v413_v33 = vsel %vm304_vm0, %v329_v19, %v340_v20  ;;  %v414_v35 = vsel %vm304_vm0, %v333_v21, %v344_v22 }
  0x5d   :  { %v165_v18 = vld [vmem:[%s164_s14] ss:$8 sm:$0x3]  ;;  %s799_s29 = sld [smem:[#allocation4 + $0x4]]  ;;  %s101_s20 = scalar_lea.vmem [#allocation5], %s763_s8 }
  0x5e   :  { %v102_v23 = vld [vmem:[%s101_s20] ss:$8 sm:$0x3]  ;;  %s806_s18 = sld [smem:[#allocation4 + $0x5]]  ;;  %s813_s21 = sadd.s32 %s777_s19, %s130_s1  ;;  %v351_v29 = vrot.slane %v165_v18, %v774_v2  ;;  %v355_v30 = vrot.slane %v165_v18, %v780_v4  ;;  %v311_v36 = vsel %vm310_vm2, %v308_v26, %v253_v24  ;;  %v312_v37 = vsel %vm310_vm2, %v309_v27, %v257_v25 }
  0x5f   :  { %s815_s5 = sld [smem:[#allocation4 + $0x6]]  ;;  %s174_s8 = scalar_lea.vmem [#allocation8], %s173_s16  ;;  %v264_v32 = vrot.slane %v102_v23, %v774_v2  ;;  %v268_v34 = vrot.slane %v102_v23, %v780_v4 }
  0x60   :  { %v175_v28 = vld [vmem:[%s174_s8] ss:$8 sm:$0x3]  ;;  %s112_s23 = scalar_lea.vmem [#allocation5], %s766_s0  ;;  %s822_s6 = sld [smem:[#allocation4 + $0x7]]  ;;  %v415_v42 = vsel %vm307_vm1, %v413_v33, %v351_v29  ;;  %v416_v44 = vsel %vm307_vm1, %v414_v35, %v355_v30 }
  0x61   :  { %v113_v31 = vld [vmem:[%s112_s23] ss:$8 sm:$0x3]  ;;  %v362_v38 = vrot.slane %v175_v28, %v774_v2  ;;  %v366_v39 = vrot.slane %v175_v28, %v780_v4  ;;  %s123_s19 = scalar_lea.vmem [#allocation5], %s770_s13  ;;  %v314_v45 = vsel %vm313_vm3, %v311_v36, %v264_v32  ;;  %v315_v46 = vsel %vm313_vm3, %v312_v37, %v268_v34  ;;  %s134_s13 = scalar_lea.vmem [#allocation5], %s813_s21 }
  0x62   :  { %v124_v40 = vld [vmem:[%s123_s19] ss:$8 sm:$0x3]  ;;  %v275_v41 = vrot.slane %v113_v31, %v774_v2  ;;  %v279_v43 = vrot.slane %v113_v31, %v780_v4 }
  0x63   :  { %s177_s1 = sshra.s32 %s799_s29, 3  ;;  %s180_s0 = sand.u32 7, %s799_s29  ;;  %v135_v47 = vld [vmem:[%s134_s13] ss:$8 sm:$0x3]  ;;  %v286_v49 = vrot.slane %v124_v40, %v774_v2  ;;  %v417_v50 = vsel %vm310_vm2, %v415_v42, %v362_v38  ;;  %v290_v51 = vrot.slane %v124_v40, %v780_v4  ;;  %v418_v52 = vsel %vm310_vm2, %v416_v44, %v366_v39 }
  0x64   :  { %s553_s24 = sshll.u32 %s177_s1, 4  ;;  %s187_s25 = sshra.s32 %s806_s18, 3  ;;  %v317_v53 = vsel %vm316_vm4, %v314_v45, %v275_v41  ;;  %v318_v55 = vsel %vm316_vm4, %v315_v46, %v279_v43  ;;  %v297_v58 = vrot.slane %v135_v47, %v774_v2  ;;  %v301_v59 = vrot.slane %v135_v47, %v780_v4 }
  0x65   :  { %s183_s2 = sadd.s32 %s553_s24, %s180_s0  ;;  %s190_s26 = sand.u32 7, %s806_s18  ;;  %v320_v0 = vsel %vm319_vm5, %v317_v53, %v286_v49  ;;  %v321_v1 = vsel %vm319_vm5, %v318_v55, %v290_v51 }
  0x66   :  { %s554_s27 = sshll.u32 %s187_s25, 4  ;;  %s184_s28 = scalar_lea.vmem [#allocation8], %s183_s2  ;;  %v323_v10 = vsel %vm322_vm6, %v320_v0, %v297_v58  ;;  %v324_v11 = vsel %vm322_vm6, %v321_v1, %v301_v59 }
  0x67   :  { %v185_v48 = vld [vmem:[%s184_s28] ss:$8 sm:$0x3]  ;;  %s193_s15 = sadd.s32 %s554_s27, %s190_s26  ;;  %s197_s7 = sshra.s32 %s815_s5, 3 }
  0x68   :  { %s200_s17 = sand.u32 7, %s815_s5  ;;  %v373_v54 = vrot.slane %v185_v48, %v774_v2  ;;  %v377_v56 = vrot.slane %v185_v48, %v780_v4  ;;  %s194_s12 = scalar_lea.vmem [#allocation8], %s193_s15 }
  0x69   :  { %v195_v57 = vld [vmem:[%s194_s12] ss:$8 sm:$0x3]  ;;  %s555_s22 = sshll.u32 %s197_s7, 4  ;;  %s207_s3 = sshra.s32 %s822_s6, 3 }
  0x6a   :  { %s203_s9 = sadd.s32 %s555_s22, %s200_s17  ;;  %s210_s10 = sand.u32 7, %s822_s6  ;;  %v384_v60 = vrot.slane %v195_v57, %v774_v2  ;;  %v419_v61 = vsel %vm313_vm3, %v417_v50, %v373_v54  ;;  %v388_v62 = vrot.slane %v195_v57, %v780_v4  ;;  %v420_v63 = vsel %vm313_vm3, %v418_v52, %v377_v56 }
  0x6b   :  { %s556_s30 = sshll.u32 %s207_s3, 4  ;;  %s204_s11 = scalar_lea.vmem [#allocation8], %s203_s9 }
  0x6c   :  { %v205_v3 = vld [vmem:[%s204_s11] ss:$8 sm:$0x3]  ;;  %s213_s14 = sadd.s32 %s556_s30, %s210_s10  ;;  %v421_v5 = vsel %vm316_vm4, %v419_v61, %v384_v60  ;;  %v422_v6 = vsel %vm316_vm4, %v420_v63, %v388_v62  ;;  %s666_s29 = smov [#allocation10]  }
  0x6d   :  { %v395_v7 = vrot.slane %v205_v3, %v774_v2  ;;  %v399_v8 = vrot.slane %v205_v3, %v780_v4  ;;  %s214_s16 = scalar_lea.vmem [#allocation8], %s213_s14  ;;  %s437_s20 = sshll.u32 %s666_s29, 4  ;;  %s438_s20 = int_to_ptr.vmem [resolvable:$true] %s437_s20 }
  0x6e   :  { %v215_v9 = vld [vmem:[%s214_s16] ss:$8 sm:$0x3]  ;;  %s630_s18 = scalar_lea.vmem %s438_s20, 256  ;;  %p635_p11 = scmp.lt.s32.totalorder %s438_s20, %s438_s20 }
  0x6f   :  { %v406_v12 = vrot.slane %v215_v9, %v774_v2  ;;  %v423_v13 = vsel %vm319_vm5, %v421_v5, %v395_v7  ;;  %v410_v14 = vrot.slane %v215_v9, %v780_v4  ;;  %v424_v15 = vsel %vm319_vm5, %v422_v6, %v399_v8  ;;  %p631_p10 = scmp.ne.s32.totalorder %s438_s20, %s630_s18  ;;  %p636_p12 = scmp.lt.s32.totalorder %s630_s18, %s630_s18 }
  0x71   :  { %v425_v16 = vsel %vm322_vm6, %v423_v13, %v406_v12  ;;  %v426_v17 = vsel %vm322_vm6, %v424_v15, %v410_v14  ;;  %p637_p13 = por %p636_p12, %p635_p11 }
  0x72   :  { %v427_v18 = vadd.f32 %v425_v16, %v323_v10  ;;  %v428_v19 = vadd.f32 %v426_v17, %v324_v11 }
  0x73   :  { %p638_p0 = pnand %p637_p13, %p631_p10 }
  0x74   :  { %429 = vst [vmem:[#allocation10] sm:$0xff] %v427_v18  ;;  %430 = vst [vmem:[#allocation10 + $0x8] sm:$0xff] %v428_v19 }
  0x75   :  { %641 = shalt.err (!%p638_p0)
}
  0x76   :  { %s642_s8 = scalar_lea.hbm %s891_s4, 256 }
  0x77   :  { %p643_p1 = scmp.ne.s32.totalorder %s891_s4, %s642_s8  ;;  %p646_p2 = scmp.lt.u32.totalorder %s642_s8, %s891_s4 }
  0x79   :  { %p648_p3 = pnand %p646_p2, %p643_p1 }
  0x7b   :  { %651 = shalt.err (!%p648_p3)
}
  0x7c   :  { %440 = dma.vmem_to_hbm [thread:$0]  %s438_s20, 256, %s891_s4, [#allocation7]  }
  0x7d   :  { %658 = dma.done.wait [#allocation7], 256  }
  0x7e   :  { %659 = vsyncadd [#allocation7], 4294967040 }
  0x7f   :  { %444 = vsyncpa [#allocation6], 1 }
  0x80   :  { %445 = vsyncpa [#allocation9], 1 }
  0x81   :  { %446 = vsyncpa [#allocation7], 1 }

</bundles_post_ra>
